<compile_context>
chip_gen: v6e
topology: v6e:2x2x1
jax: 0.10.0
libtpu: 0.0.40
codegen_flags: <defaults>
</compile_context>

<pallas_src>
import jax
import jax.numpy as jnp
from jax import lax
from jax.experimental import pallas as pl
from jax.experimental.pallas import tpu as pltpu


def _round_up(n, m):
    return ((n + m - 1) // m) * m


def _pick_tile_rows(batch, hidden):
    """Rows per batch tile.

    Large tiles amortize the ~0.35us/grid-step overhead; the double-buffered
    f32 x tile is kept under ~8 MiB so the pipeline fits comfortably within
    the scoped-VMEM defaults on every generation (v5e 16 MiB .. v7x 32 MiB).
    """
    cap = (8 * 1024 * 1024) // (2 * hidden * 4)   # rows per buffer @ 8 MiB
    cap = max(128, min(1024, cap))
    cap = (cap // 128) * 128                      # lane-dense output tiles
    b8 = _round_up(max(batch, 1), 8)
    if b8 <= cap:
        return b8                                 # single tile covers batch
    return cap


def _output_logiqa_kernel(x_ref, w_ref, b_ref, o_ref):
    # logits^T = W @ x^T : (4, H) x (TM, H)^T -> (4, TM).
    # Classes live on sublanes, batch rows on lanes -> lane-dense stores.
    logits_t = lax.dot_general(
        w_ref[...], x_ref[...],
        dimension_numbers=(((1,), (1,)), ((), ())),
        preferred_element_type=jnp.float32,
    ) + b_ref[...]                                # bias is (4, 1)

    # Numerically stable log_softmax over the 4 classes (torch dim=1).
    m = jnp.max(logits_t, axis=0, keepdims=True)
    shifted = logits_t - m
    lse = jnp.log(jnp.sum(jnp.exp(shifted), axis=0, keepdims=True))
    o_ref[...] = (shifted - lse).astype(o_ref.dtype)


def output_logiqa_blstm(x, w, b, mask=None):
    """x: (B, H) f32, w: (4, H), b: (4,) -> (B, 4) log-probabilities.

    `mask` is accepted for parity with the PyTorch forward but unused.
    """
    del mask
    B, H = x.shape
    num_classes = w.shape[0]

    tm = _pick_tile_rows(B, H)
    grid = pl.cdiv(B, tm)          # partial last x tile is handled by Pallas
    b_out = grid * tm              # padded batch extent of the stored slab

    b2 = b.reshape(num_classes, 1)

    flops = 2 * B * H * num_classes
    bytes_accessed = (B * H + num_classes * H + num_classes
                      + B * num_classes) * 4

    out_t = pl.pallas_call(
        _output_logiqa_kernel,
        out_shape=jax.ShapeDtypeStruct((num_classes, b_out), jnp.float32),
        grid_spec=pltpu.PrefetchScalarGridSpec(
            num_scalar_prefetch=0,
            grid=(grid,),
            in_specs=[
                pl.BlockSpec((tm, H), lambda i: (i, 0)),            # x tile
                pl.BlockSpec((num_classes, H), lambda i: (0, 0)),   # resident W
                pl.BlockSpec((num_classes, 1), lambda i: (0, 0)),   # resident b
            ],
            out_specs=pl.BlockSpec((num_classes, tm), lambda i: (0, i)),
        ),
        compiler_params=pltpu.CompilerParams(
            dimension_semantics=("parallel",)),
        cost_estimate=pl.CostEstimate(
            flops=flops,
            transcendentals=B * num_classes,
            bytes_accessed=bytes_accessed),
    )(x, w, b2)

    # (4, B_pad) -> (B, 4); drop rows belonging to the padded final tile.
    return out_t[:, :B].T


def _reference(x, w, b):
    logits = x @ w.T + b
    return jax.nn.log_softmax(logits, axis=1)


if __name__ == "__main__":
    key = jax.random.PRNGKey(0)
    kx, kw, kb = jax.random.split(key, 3)

    B, H = 2, 32  # small shapes: batch=2, hidden_size=32

    x = jax.random.normal(kx, (B, H), dtype=jnp.float32)
    mask = jnp.ones((B, H), dtype=jnp.float32)  # unused, parity with torch

    # Deterministic Linear(hidden_size, 4) params (PyTorch-style uniform init).
    bound = 1.0 / (H ** 0.5)
    w = jax.random.uniform(kw, (4, H), minval=-bound, maxval=bound,
                           dtype=jnp.float32)
    b = jax.random.uniform(kb, (4,), minval=-bound, maxval=bound,
                           dtype=jnp.float32)

    out = jax.jit(output_logiqa_blstm)(x, w, b, mask)
    out = jax.block_until_ready(out)

    ref = _reference(x, w, b)
    assert out.shape == (B, 4)
    assert jnp.allclose(out, ref, atol=1e-5, rtol=1e-5), (out, ref)

    print("KERNEL_OK")
</pallas_src>

<mosaic_0001>
module attributes {stable_mosaic.version = 11 : i64} {
  func.func @_output_logiqa_kernel(%arg0: i32, %arg1: memref<8x32xf32, #tpu.memory_space<vmem>>, %arg2: memref<4x32xf32, #tpu.memory_space<vmem>>, %arg3: memref<4x1xf32, #tpu.memory_space<vmem>>, %arg4: memref<4x8xf32, #tpu.memory_space<vmem>>) attributes {dimension_semantics = [#tpu.dimension_semantics<parallel>], iteration_bounds = array<i64: 1>, scalar_prefetch = 0 : i64, scratch_operands = 0 : i64, tpu.core_type = #tpu.core_type<tc>, window_params = [{transform_indices = @transform_0, window_bounds = array<i64: 8, 32>}, {pipeline_mode = #tpu.pipeline_mode<synchronous>, transform_indices = @transform_1, window_bounds = array<i64: 4, 32>}, {pipeline_mode = #tpu.pipeline_mode<synchronous>, transform_indices = @transform_2, window_bounds = array<i64: 4, 1>}, {transform_indices = @transform_3, window_bounds = array<i64: 4, 8>}]} {
    %c0 = arith.constant 0 : index
    %c0_0 = arith.constant 0 : index
    %0 = vector.load %arg2[%c0, %c0_0] : memref<4x32xf32, #tpu.memory_space<vmem>>, vector<4x32xf32>
    %c0_1 = arith.constant 0 : index
    %c0_2 = arith.constant 0 : index
    %1 = vector.load %arg1[%c0_1, %c0_2] : memref<8x32xf32, #tpu.memory_space<vmem>>, vector<8x32xf32>
    %cst = arith.constant dense<0.000000e+00> : vector<4x8xf32>
    %2 = tpu.matmul %0, %1, %cst {dimension_numbers = #tpu.dot_dimension_numbers<[1], [1], [0], [0], [0, 0, 1, 0], [], []>} : vector<4x32xf32>, vector<8x32xf32>, vector<4x8xf32> -> vector<4x8xf32>
    %c0_3 = arith.constant 0 : index
    %c0_4 = arith.constant 0 : index
    %3 = vector.load %arg3[%c0_3, %c0_4] : memref<4x1xf32, #tpu.memory_space<vmem>>, vector<4x1xf32>
    %4 = vector.broadcast %3 : vector<4x1xf32> to vector<4x8xf32>
    %5 = arith.addf %2, %4 : vector<4x8xf32>
    %cst_5 = arith.constant dense<0xFF800000> : vector<8xf32>
    %6 = vector.multi_reduction <maximumf>, %5, %cst_5 [0] : vector<4x8xf32> to vector<8xf32>
    %7 = vector.shape_cast %6 : vector<8xf32> to vector<1x8xf32>
    %8 = vector.broadcast %7 : vector<1x8xf32> to vector<4x8xf32>
    %9 = arith.subf %5, %8 : vector<4x8xf32>
    %10 = math.exp %9 : vector<4x8xf32>
    %cst_6 = arith.constant dense<0.000000e+00> : vector<8xf32>
    %11 = vector.multi_reduction <add>, %10, %cst_6 [0] : vector<4x8xf32> to vector<8xf32>
    %12 = vector.shape_cast %11 : vector<8xf32> to vector<1x8xf32>
    %13 = math.log %12 : vector<1x8xf32>
    %14 = vector.broadcast %13 : vector<1x8xf32> to vector<4x8xf32>
    %15 = arith.subf %9, %14 : vector<4x8xf32>
    %c0_7 = arith.constant 0 : index
    %c0_8 = arith.constant 0 : index
    %16 = vector.load %arg4[%c0_7, %c0_8] : memref<4x8xf32, #tpu.memory_space<vmem>>, vector<4x8xf32>
    tpu.vector_store %arg4[%c0_7, %c0_8], %15 {strides = array<i32>} : memref<4x8xf32, #tpu.memory_space<vmem>>, vector<4x8xf32>,
    return
  }
  func.func @transform_0(%arg0: i32) -> (i32, i32) {
    %c0_i32 = arith.constant 0 : i32
    %c0_i32_0 = arith.constant 0 : i32
    return %arg0, %c0_i32 : i32, i32
  }
  func.func @transform_1(%arg0: i32) -> (i32, i32) {
    %c0_i32 = arith.constant 0 : i32
    %c0_i32_0 = arith.constant 0 : i32
    %c0_i32_1 = arith.constant 0 : i32
    return %c0_i32, %c0_i32_0 : i32, i32
  }
  func.func @transform_2(%arg0: i32) -> (i32, i32) {
    %c0_i32 = arith.constant 0 : i32
    %c0_i32_0 = arith.constant 0 : i32
    %c0_i32_1 = arith.constant 0 : i32
    return %c0_i32, %c0_i32_0 : i32, i32
  }
  func.func @transform_3(%arg0: i32) -> (i32, i32) {
    %c0_i32 = arith.constant 0 : i32
    %c0_i32_0 = arith.constant 0 : i32
    return %c0_i32, %arg0 : i32, i32
  }
}

</mosaic_0001>

<bundles_post_ra>
// kernel: output_logiqa_blstm.1
= control target key start
LH: loop header
LB: loop body
LE: loop exit
PB: predicated region body
PF: predicated region fallthrough
CT: control target
= control target key end

     0   :  { %vm22_vm0 = vcmask 261120   ;;  %v142_v0 = vmov 0.0   ;;  %vm143_vm1 = vmmov 0   ;;  %v144_v4 = vmov 0   ;;  %s180_s0 = inlined_call_operand.vmem [shape: f32[2,32], index: 0, kind: input, shape index: {}]   ;;  %s181_s1 = inlined_call_operand.vmem [shape: f32[4,32], index: 1, kind: input, shape index: {}]   ;;  %s182_s2 = inlined_call_operand.vmem [shape: f32[4,1], index: 2, kind: input, shape index: {}]   ;;  %s183_s3 = inlined_call_operand.vmem [shape: f32[4,8], index: 3, kind: output, shape index: {}]  }
   0x1   :  { %129 = vmatprep.subr.mxu0 %v142_v0  ;;  %v15_v1 = vld [vmem:[%s180_s0] sm:$0xff]  ;;  %131 = vmatprep.mubr.msk.f32.mxu0 %vm143_vm1, %v142_v0  ;;  %vm99_vm2 = vcmask 60416  }
   0x2   :  { %v16_v2 = vld [vmem:[%s182_s2] sm:$0xf]  ;;  %130 = vmatpush3.xpose.msk.msra.mxu0 %vm22_vm0, %v15_v1  ;;  %137 = vset.pattern.permute.xlu0 %v144_v4 }
   0x3   :  { %v14_v3 = vld [vmem:[%s181_s1] sm:$0xf]  ;;  %19 = vperm.xlu0 %137, %v16_v2  }
   0x5   :  { %132 = vmatmul.mubr.msk.f32.vlgmr.msra.gmra.mxu0 %vm22_vm0, %v14_v3 }
  0x7e   :  { %v20_v5 = vpop.permute.xlu0 %19 }
  0xc5   :  { %v95_v6 = vpop.f32.mrf.mxu0 }
  0xc6   :  { %v96_v7 = vadd.f32 %v95_v6, %v20_v5 }
  0xc7   :  { %v133_v8 = vpop.f32.mrf.mxu0 }
  0xc8   :  { %v100_v9 = vsel %vm99_vm2, %v96_v7, -inf }
  0xc9   :  { %v101_v10 = vrot.slane %v100_v9, 4 }
  0xcb   :  { %v102_v11 = vmax.f32 %v100_v9, %v101_v10 }
  0xcd   :  { %v103_v12 = vrot.slane %v102_v11, 2 }
  0xcf   :  { %v104_v13 = vmax.f32 %v102_v11, %v103_v12 }
  0xd1   :  { %v105_v14 = vrot.slane %v104_v13, 1 }
  0xd3   :  { %v106_v15 = vmax.f32 %v104_v13, %v105_v14 }
  0xd5   :  { %v107_v16 = vsub.f32 %v96_v7, %v106_v15 }
  0xd7   :  { %v108_v17 = vmul.f32 1.442695, %v107_v16 }
  0xd9   :  { %138 = vpow2.f32 %v108_v17 }
  0xe6   :  { %v139_v18 = vpop.eup %138 }
  0xe7   :  { %v110_v19 = vsel %vm99_vm2, %v139_v18, 0.0 }
  0xe8   :  { %v111_v20 = vrot.slane %v110_v19, 4 }
  0xea   :  { %v112_v21 = vadd.f32 %v111_v20, %v110_v19 }
  0xec   :  { %v113_v22 = vrot.slane %v112_v21, 2 }
  0xee   :  { %v114_v23 = vadd.f32 %v113_v22, %v112_v21 }
  0xf0   :  { %v115_v24 = vrot.slane %v114_v23, 1 }
  0xf2   :  { %v116_v25 = vadd.f32 %v115_v24, %v114_v23 }
  0xf4   :  { %140 = vlog2.f32 %v116_v25 }
 0x101   :  { %v141_v26 = vpop.eup %140 }
 0x102   :  { %v118_v27 = vmul.f32 0.6931472, %v141_v26 }
 0x104   :  { %v119_v28 = vsub.f32 %v107_v16, %v118_v27 }
 0x106   :  { %120 = vst.msk [vmem:[%s183_s3] sm:$0xf] %vm99_vm2, %v119_v28 }

</bundles_post_ra>
